<compile_context>
chip_gen: v7x
topology: tpu7x:2x2x1
jax: 0.10.0
libtpu: 0.0.40
codegen_flags: <defaults>
</compile_context>

<pallas_src>
import functools

import numpy as np
import jax
import jax.numpy as jnp
from jax import lax
from jax.experimental import pallas as pl
from jax.experimental.pallas import tpu as pltpu


# ---------------------------------------------------------------------------
# Synthetic hyperparameters mirroring the module's `args`.
# ---------------------------------------------------------------------------
class Args:
    num_blocks = 2
    block_repeats = 2
    num_channels = 8
    kernel_size = 3
    useBatchNorm = True
    residual = "add"      # 'add' keeps channel count constant through all blocks


ARGS = Args()
BN_EPS = 1e-5


# ---------------------------------------------------------------------------
# One-time probe (hoisted out of the forward path): pin down the lane-rotate
# convention of pltpu.roll so tap shifts are provably in the right direction.
# ---------------------------------------------------------------------------
@functools.lru_cache(maxsize=None)
def _roll_moves_to_higher_index():
    def probe(x_ref, o_ref):
        o_ref[...] = pltpu.roll(x_ref[...], shift=1, axis=1)

    x = jnp.broadcast_to(jnp.arange(128, dtype=jnp.float32), (8, 128))
    y = pl.pallas_call(
        probe, out_shape=jax.ShapeDtypeStruct((8, 128), jnp.float32))(x)
    # jnp.roll semantics: result[i] = x[i - shift]  =>  y[0, 1] == x[0, 0] == 0
    return bool(y[0, 1] == 0.0)


# ---------------------------------------------------------------------------
# Fused Pallas kernel: the whole Body in a single call, activation in vregs.
# ---------------------------------------------------------------------------
def _fused_body_kernel(*refs, num_blocks, block_repeats, has_residual,
                       taps, cin, cout, n, shifts, n_w):
    """refs = (x, masks, w_0..w_{n_w-1}, b_0..b_{n_w-1}, out).

    x_ref    : [cin, n]          input activation, channels x flattened spatial
    masks_ref: [taps*cin, n]     0/1 validity per (tap, cin) row (zero padding)
    w_ref[g] : [rows_g, taps*cin]  BN-folded GEMM weights (rows_g = cout or 2*cout)
    b_ref[g] : [rows_g, n]       BN-folded biases, pre-broadcast over lanes
    out_ref  : [cout, n]
    """
    x_ref, masks_ref = refs[0], refs[1]
    w_refs = refs[2:2 + n_w]
    b_refs = refs[2 + n_w:2 + 2 * n_w]
    out_ref = refs[2 + 2 * n_w]

    def build_xcol(a):
        # One XLU lane-rotate per tap (masks handle wrap-around & boundaries),
        # then a single lane-dense mask multiply over the whole column block.
        cols = []
        for t in range(taps):                          # static unroll (27)
            sh = shifts[t]
            cols.append(a if sh == 0 else pltpu.roll(a, shift=sh, axis=1))
        return jnp.concatenate(cols, axis=0) * masks_ref[...]   # [taps*cin, n]

    def gemm(gi, xcol):
        # Single lane-dense MXU GEMM: [rows, taps*cin] @ [taps*cin, n]
        return (jnp.dot(w_refs[gi][...], xcol,
                        preferred_element_type=jnp.float32)
                + b_refs[gi][...])

    s = x_ref[...]                                     # [cin, n], 1 vreg
    gi = 0
    for _blk in range(num_blocks):
        xcol = build_xcol(s)                           # taps of block input
        y = gemm(gi, xcol); gi += 1                    # fused right + left[0]
        if has_residual:
            r = y[:cout, :]                            # shortcut conv output
            h = y[cout:, :]                            # left[0] output
        else:
            r, h = None, y
        for _rep in range(1, block_repeats):
            h = jnp.maximum(h, 0.0)                    # inter-conv ReLU
            h = gemm(gi, build_xcol(h)); gi += 1
        if has_residual:
            h = h + r                                  # residual 'add'
        s = jnp.maximum(h, 0.0)                        # block-final ReLU
    out_ref[...] = s                                   # direct final store


# ---------------------------------------------------------------------------
# Host-side geometry: flat tap offsets + boundary masks (precomputed, tiny).
# ---------------------------------------------------------------------------
def _tap_geometry(B, D, H, W, K):
    """Flat lane offsets and 0/1 validity masks for the K^3 conv taps."""
    p = K // 2
    N = B * D * H * W
    nidx = np.arange(N)
    d = (nidx // (H * W)) % D
    h = (nidx // W) % H
    w = nidx % W
    offs, masks = [], []
    for kd in range(K):
        for kh in range(K):
            for kw in range(K):
                dd, dh, dw = kd - p, kh - p, kw - p
                offs.append(dd * H * W + dh * W + dw)
                valid = ((d + dd >= 0) & (d + dd < D) &
                         (h + dh >= 0) & (h + dh < H) &
                         (w + dw >= 0) & (w + dw < W))
                masks.append(valid.astype(np.float32))
    return offs, np.stack(masks, axis=0)               # [K^3, N]


# ---------------------------------------------------------------------------
# Parameter setup, BN folding, GEMM-form weight packing (hoisted, done once).
# ---------------------------------------------------------------------------
def _init_conv(key, cin, cout, K):
    kw, kb = jax.random.split(key)
    fan_in = cin * K ** 3
    bound = 1.0 / float(fan_in) ** 0.5
    w = jax.random.uniform(kw, (cout, cin, K, K, K), jnp.float32, -bound, bound)
    b = jax.random.uniform(kb, (cout,), jnp.float32, -bound, bound)
    return w, b


def _init_bn(key, c):
    k1, k2, k3, k4 = jax.random.split(key, 4)
    gamma = jax.random.uniform(k1, (c,), jnp.float32, 0.5, 1.5)
    beta = 0.1 * jax.random.normal(k2, (c,), jnp.float32)
    mean = 0.1 * jax.random.normal(k3, (c,), jnp.float32)
    var = jax.random.uniform(k4, (c,), jnp.float32, 0.5, 1.5)
    return gamma, beta, mean, var


def _fold_bn(w, b, bn):
    """Fold eval-mode BatchNorm3d into conv weight (Cout,Cin,K,K,K) and bias."""
    if bn is None:
        return w, b
    gamma, beta, mean, var = bn
    scale = gamma / jnp.sqrt(var + BN_EPS)
    w = w * scale[:, None, None, None, None]
    b = (b - mean) * scale + beta
    return w, b


def _to_gemm(w):
    """(Cout, Cin, K, K, K) -> (Cout, K^3*Cin); column index = t*Cin + cin."""
    cout, cin, K, _, _ = w.shape
    return jnp.transpose(w, (0, 2, 3, 4, 1)).reshape(cout, K ** 3 * cin)


def make_params(key, args):
    """Mirror Block.get_left / get_right (residual='add' -> no channel doubling)."""
    params = []
    for _blk in range(args.num_blocks):
        left = []
        for _rep in range(args.block_repeats):
            key, k1, k2 = jax.random.split(key, 3)
            w, b = _init_conv(k1, args.num_channels, args.num_channels,
                              args.kernel_size)
            bn = _init_bn(k2, args.num_channels) if args.useBatchNorm else None
            left.append((w, b, bn))
        right = []
        if args.residual is not None:
            key, k1, k2 = jax.random.split(key, 3)
            w, b = _init_conv(k1, args.num_channels, args.num_channels,
                              args.kernel_size)
            bn = _init_bn(k2, args.num_channels) if args.useBatchNorm else None
            right.append((w, b, bn))
        params.append((left, right))
    return params


def prepare_fused_weights(params, args):
    """BN-fold + pack every conv of the Body into GEMM weights/biases.

    Per block: group 0 stacks the shortcut conv and left[0] into one
    [2*Cout, K^3*Cin] GEMM (they share the same xcol); the remaining left
    convs are [Cout, K^3*Cin] each.  Returns (list of weights, list of biases).
    """
    w_list, b_list = [], []
    for (left, right) in params:
        w0, b0, bn0 = left[0]
        wl0, bl0 = _fold_bn(w0, b0, bn0)
        if args.residual == "add":
            wr, br, bnr = right[0]
            wrf, brf = _fold_bn(wr, br, bnr)
            w_list.append(jnp.concatenate([_to_gemm(wrf), _to_gemm(wl0)], axis=0))
            b_list.append(jnp.concatenate([brf, bl0], axis=0))
        else:
            w_list.append(_to_gemm(wl0))
            b_list.append(bl0)
        for (w, b, bn) in left[1:]:
            wf, bf = _fold_bn(w, b, bn)
            w_list.append(_to_gemm(wf))
            b_list.append(bf)
    w_list = [w.astype(jnp.float32) for w in w_list]
    b_list = [b.astype(jnp.float32) for b in b_list]
    return w_list, b_list


# ---------------------------------------------------------------------------
# Body.forward with the fused Pallas kernel.
# ---------------------------------------------------------------------------
def body_forward_pallas(x, w_list, b_list, args):
    """x: (B, D, H, W, C) channels-last (PyTorch reference is NCDHW)."""
    B, D, H, W, C = x.shape
    K = args.kernel_size
    N = B * D * H * W
    taps = K ** 3

    offs, masks_np = _tap_geometry(B, D, H, W, K)
    if _roll_moves_to_higher_index():              # jnp.roll convention
        shifts = tuple((-o) % N for o in offs)
    else:                                          # inverted convention
        shifts = tuple(o % N for o in offs)

    # Masks pre-broadcast over Cin -> one lane-dense multiply in-kernel.
    masks_big = jnp.asarray(
        np.repeat(masks_np[:, None, :], C, axis=1).reshape(taps * C, N))

    # Biases pre-broadcast over lanes -> plain lane-dense vadd in-kernel.
    b_ops = [jnp.broadcast_to(b[:, None], (b.shape[0], N)) for b in b_list]

    x_cn = jnp.transpose(x, (4, 0, 1, 2, 3)).reshape(C, N).astype(jnp.float32)

    n_w = len(w_list)
    kern = functools.partial(
        _fused_body_kernel,
        num_blocks=args.num_blocks,
        block_repeats=args.block_repeats,
        has_residual=(args.residual == "add"),
        taps=taps, cin=C, cout=args.num_channels, n=N,
        shifts=shifts, n_w=n_w)

    flops = 2 * sum(int(w.shape[0]) * int(w.shape[1]) * N for w in w_list)
    bytes_accessed = 4 * int(x_cn.size + masks_big.size
                             + sum(w.size for w in w_list)
                             + sum(b.size for b in b_ops)
                             + args.num_channels * N)

    vmem = pl.BlockSpec(memory_space=pltpu.MemorySpace.VMEM)
    out = pl.pallas_call(
        kern,
        out_shape=jax.ShapeDtypeStruct((args.num_channels, N), jnp.float32),
        in_specs=[vmem] * (2 + 2 * n_w),
        out_specs=vmem,
        cost_estimate=pl.CostEstimate(flops=flops, transcendentals=0,
                                      bytes_accessed=bytes_accessed),
    )(x_cn, masks_big, *w_list, *b_ops)

    Cout = args.num_channels
    return jnp.transpose(out.reshape(Cout, B, D, H, W), (1, 2, 3, 4, 0))


# ---------------------------------------------------------------------------
# Pure-JAX reference (lax.conv) for correctness checking.
# ---------------------------------------------------------------------------
def _conv3d_ref(x, w, b, K):
    w_dhwio = jnp.transpose(w, (2, 3, 4, 1, 0))
    p = K // 2
    y = lax.conv_general_dilated(
        x, w_dhwio, window_strides=(1, 1, 1),
        padding=[(p, p)] * 3,
        dimension_numbers=("NDHWC", "DHWIO", "NDHWC"))
    return y + b


def body_forward_ref(params, x, args):
    K = args.kernel_size
    s = x
    for (left, right) in params:
        h = s
        for rep, (w, b, bn) in enumerate(left):
            wf, bf = _fold_bn(w, b, bn)
            h = _conv3d_ref(h, wf, bf, K)
            if rep + 1 < len(left):
                h = jax.nn.relu(h)
        if args.residual == "add":
            w_r, b_r, bn_r = right[0]
            wr, br = _fold_bn(w_r, b_r, bn_r)
            r = _conv3d_ref(s, wr, br, K)
            s = jax.nn.relu(h + r)
        else:
            s = jax.nn.relu(h)
    return s


if __name__ == "__main__":
    key = jax.random.PRNGKey(0)
    kx, kp = jax.random.split(key)

    # NDHWC (PyTorch equivalent: NCDHW [2, 8, 4, 4, 4]);  N = B*D*H*W = 128 lanes.
    B, D, H, W, C = 2, 4, 4, 4, ARGS.num_channels
    x = jax.random.normal(kx, (B, D, H, W, C), jnp.float32)
    params = make_params(kp, ARGS)

    # Weight prep (BN folding + GEMM packing + shortcut/left[0] fusion) hoisted
    # out of the forward path.
    w_list, b_list = prepare_fused_weights(params, ARGS)

    out = body_forward_pallas(x, w_list, b_list, ARGS)
    out = jax.block_until_ready(out)

    ref = body_forward_ref(params, x, ARGS)
    assert out.shape == (B, D, H, W, C), out.shape
    if not jnp.allclose(out, ref, rtol=1e-4, atol=1e-4):
        err = float(jnp.max(jnp.abs(out - ref)))
        raise AssertionError(f"Pallas Body output mismatch, max abs err {err}")

    print("KERNEL_OK")
</pallas_src>

<mosaic_0001>
module attributes {stable_mosaic.version = 11 : i64} {
  func.func @probe(%arg0: memref<8x128xf32, #tpu.memory_space<vmem>>, %arg1: memref<8x128xf32, #tpu.memory_space<vmem>>) attributes {dimension_semantics = [], scalar_prefetch = 0 : i64, scratch_operands = 0 : i64, tpu.core_type = #tpu.core_type<tc>} {
    %c0 = arith.constant 0 : index
    %c0_0 = arith.constant 0 : index
    %0 = vector.load %arg0[%c0, %c0_0] : memref<8x128xf32, #tpu.memory_space<vmem>>, vector<8x128xf32>
    %c1_i32 = arith.constant 1 : i32
    %1 = tpu.dynamic_rotate %0 by %c1_i32 dim 1 : vector<8x128xf32>, i32 -> vector<8x128xf32>
    %c0_1 = arith.constant 0 : index
    %c0_2 = arith.constant 0 : index
    %2 = vector.load %arg1[%c0_1, %c0_2] : memref<8x128xf32, #tpu.memory_space<vmem>>, vector<8x128xf32>
    tpu.vector_store %arg1[%c0_1, %c0_2], %1 {strides = array<i32>} : memref<8x128xf32, #tpu.memory_space<vmem>>, vector<8x128xf32>,
    return
  }
}

</mosaic_0001>

<bundles_post_ra>
// kernel: tpu_custom_call.1
= control target key start
LH: loop header
LB: loop body
LE: loop exit
PB: predicated region body
PF: predicated region fallthrough
CT: control target
= control target key end

     0   :  { %6 = vsyncpa [#allocation3], 0  ;;  %s128_s0 = inlined_call_operand.hbm [shape: f32[8,128], index: 0, kind: input, shape index: {}]   ;;  %s129_s1 = inlined_call_operand.hbm [shape: f32[8,128], index: 1, kind: output, shape index: {}]  }
   0x1   :  { %7 = vsyncpa [#allocation4], 0  ;;  %s91_s6 = smov [#allocation2]   ;;  %s43_s10 = scalar_lea.hbm %s128_s0, 128 }
   0x2   :  { %s14_s7 = sshll.u32 %s91_s6, 4  ;;  %p44_p0 = scmp.ne.s32.totalorder %s128_s0, %s43_s10  ;;  %s15_s7 = int_to_ptr.vmem [resolvable:$true] %s14_s7 }
   0x3   :  { %p47_p1 = scmp.lt.u32.totalorder %s43_s10, %s128_s0 }
   0x5   :  { %p49_p2 = pnand %p47_p1, %p44_p0 }
   0x7   :  { %52 = shalt.err (!%p49_p2)
}
   0x8   :  { %s53_s15 = scalar_lea.vmem %s15_s7, 128  ;;  %p58_p4 = scmp.lt.s32.totalorder %s15_s7, %s15_s7 }
   0x9   :  { %p54_p3 = scmp.ne.s32.totalorder %s15_s7, %s53_s15  ;;  %p59_p5 = scmp.lt.s32.totalorder %s53_s15, %s53_s15 }
   0xb   :  { %p60_p6 = por %p59_p5, %p58_p4 }
   0xd   :  { %p61_p7 = pnand %p60_p6, %p54_p3 }
   0xf   :  { %64 = shalt.err (!%p61_p7)
}
  0x10   :  { %17 = dma.hbm_to_vmem [thread:$0]  %s128_s0, 128, %s15_s7, [#allocation3]  }
  0x11   :  { %87 = dma.done.wait [#allocation3], 128  }
  0x12   :  { %88 = vsyncadd [#allocation3], 4294967168  ;;  %v21_v0 = vld [vmem:[#allocation2] sm:$0xff]  ;;  %s92_s18 = smov 1   ;;  %s93_s19 = smov [#allocation5]  }
  0x13   :  { %22 = vrot.lane.b32.xlu0 %v21_v0, %s92_s18  ;;  %s31_s20 = sshll.u32 %s93_s19, 4  ;;  %s32_s20 = int_to_ptr.vmem [resolvable:$true] %s31_s20 }
  0x14   :  { %s65_s21 = scalar_lea.vmem %s32_s20, 128  ;;  %p70_p9 = scmp.lt.s32.totalorder %s32_s20, %s32_s20 }
  0x15   :  { %p66_p8 = scmp.ne.s32.totalorder %s32_s20, %s65_s21  ;;  %p71_p10 = scmp.lt.s32.totalorder %s65_s21, %s65_s21 }
  0x17   :  { %p72_p11 = por %p71_p10, %p70_p9 }
  0x19   :  { %p73_p12 = pnand %p72_p11, %p66_p8 }
  0x85   :  { %v23_v1 = vpop.permute.xlu0 %22 }
  0x86   :  { %24 = vst [vmem:[#allocation5] sm:$0xff] %v23_v1 }
  0x87   :  { %76 = shalt.err (!%p73_p12)
}
  0x88   :  { %s77_s0 = scalar_lea.hbm %s129_s1, 128 }
  0x89   :  { %p78_p13 = scmp.ne.s32.totalorder %s129_s1, %s77_s0  ;;  %p81_p0 = scmp.lt.u32.totalorder %s77_s0, %s129_s1 }
  0x8b   :  { %p83_p1 = pnand %p81_p0, %p78_p13 }
  0x8d   :  { %86 = shalt.err (!%p83_p1)
}
  0x8e   :  { %34 = dma.vmem_to_hbm [thread:$0]  %s32_s20, 128, %s129_s1, [#allocation4]  }
  0x8f   :  { %89 = dma.done.wait [#allocation4], 128  }
  0x90   :  { %90 = vsyncadd [#allocation4], 4294967168 }
  0x91   :  { %38 = vsyncpa [#allocation3], 1 }
  0x92   :  { %39 = vsyncpa [#allocation4], 1 }

</bundles_post_ra>
